<compile_context>
chip_gen: v6e
topology: v6e:2x2x1
jax: 0.10.0
libtpu: 0.0.40
codegen_flags: <defaults>
</compile_context>

<pallas_src>
import functools

import jax
import jax.numpy as jnp
from jax.experimental import pallas as pl
from jax.experimental.pallas import tpu as pltpu


def _round_up(x, m):
    return ((x + m - 1) // m) * m


def _loss_log_haz_ind_kernel(phi_ref, tgt_ref, out_ref, *, num_time_bins, n_rows, tile_n):
    T = num_time_bins
    i = pl.program_id(0)

    phi = phi_ref[...].astype(jnp.float32)        # (T+1, TILE_N)
    tgt = tgt_ref[...]                            # (4,   TILE_N) f32

    phi_h = phi[:T, :]                            # hazard logits        (T, TILE_N)
    ind_sv = phi[T:T + 1, :]                      # individual survival  (1, TILE_N)

    idx_dur = tgt[0:1, :].astype(jnp.int32)       # (1, TILE_N)
    events = tgt[1:2, :]
    t_ind_sv = tgt[2:3, :]
    t_org_event = tgt[3:4, :]

    # Batch-validity mask: kills zero-padded lanes and OOB-garbage lanes of the tail tile.
    col = jax.lax.broadcasted_iota(jnp.int32, (1, tile_n), 1) + i * tile_n
    valid = col < n_rows                          # bool (1, TILE_N)

    # --- survival NLL (nll_logistic_hazard) --------------------------------
    trow = jax.lax.broadcasted_iota(jnp.int32, (T, tile_n), 0)
    le = jnp.logical_and(trow <= idx_dur, valid)  # (T, TILE_N)
    eq = jnp.logical_and(trow == idx_dur, valid)  # (T, TILE_N)

    # softplus(x) = max(x, 0) + log(1 + exp(-|x|))   (exp/log run on the EUP)
    sp = jnp.maximum(phi_h, 0.0) + jnp.log(1.0 + jnp.exp(-jnp.abs(phi_h)))

    # cumsum(BCE).gather(idx)  ==  sum_{j<=idx} softplus(phi_j) - event * phi_idx
    # valid is folded into the element-level selects so padded NaN/inf never reach the sum.
    contrib = jnp.where(le, sp, 0.0) - jnp.where(eq, phi_h * events, 0.0)
    surv_p = jnp.sum(contrib)                     # scalar

    # --- masked individual-survival MSE ------------------------------------
    hs = jnp.logical_and(valid, t_org_event > 0.0)        # bool (1, TILE_N)
    diff = ind_sv - t_ind_sv
    mse_p = jnp.sum(jnp.where(hs, diff * diff, 0.0))       # scalar
    hs_p = jnp.sum(jnp.where(hs, 1.0, 0.0))                # scalar

    # --- emit one lane-dense (1, 128) row of partial sums -------------------
    lane = jax.lax.broadcasted_iota(jnp.int32, (1, 128), 1)
    out_ref[0] = (jnp.where(lane == 0, surv_p, 0.0)
                  + jnp.where(lane == 1, mse_p, 0.0)
                  + jnp.where(lane == 2, hs_p, 0.0))


def _vmem_plan():
    """Return (vmem_limit_bytes, tile_budget_bytes, min_grid_tiles) per TPU generation."""
    try:
        cap = int(pltpu.get_tpu_info().vmem_capacity_bytes)
    except Exception:
        cap = None
    if cap is not None and cap >= 96 * 1024 * 1024:
        # v5e / v6e: 128 MiB physical VMEM, single TensorCore -> go big.
        return 64 * 1024 * 1024, 40 * 1024 * 1024, 2
    # v7x (64 MiB VMEM, 2 TCs/chip) or unknown: stay conservative, keep >= 4 grid tiles
    # so the "parallel" axis can be split across both TensorCores.
    return 48 * 1024 * 1024, 24 * 1024 * 1024, 4


def _choose_tile_n(n_pad, phi_cols, phi_itemsize, budget_bytes, min_tiles):
    """Largest multiple-of-128 lane tile whose double-buffered footprint fits the budget."""
    sub_mult = 16 if phi_itemsize == 2 else 8
    sub_phi = _round_up(phi_cols, sub_mult)
    sub_tgt = 8
    T = phi_cols - 1
    # double-buffered input tiles + headroom for the f32 (T, tile_n) intermediates.
    per_col = 2 * (sub_phi * phi_itemsize + sub_tgt * 4) + 10 * T * 4
    tile = budget_bytes // max(per_col, 1)
    # keep >= min_tiles grid steps when the batch is large enough (megacore / v7x 2 TCs)
    tile = min(tile, max(_round_up(pl.cdiv(n_pad, min_tiles), 128), 128))
    tile = min(tile, n_pad, 65536)
    tile = max(128, (tile // 128) * 128)
    return int(tile)


def loss_log_haz_ind(phi, target_loghaz, alpha=0.5, tile_n=None):
    """phi: (N, T+1) f32/bf16; target_loghaz: (N, 4) = [idx_dur, event, t_ind_sv, t_org_event]."""
    n, phi_cols = phi.shape
    num_time_bins = phi_cols - 1

    # Accept bf16 logits directly; everything else goes through f32.
    if phi.dtype != jnp.bfloat16:
        phi = phi.astype(jnp.float32)
    tgt = target_loghaz.astype(jnp.float32)

    # Lane-dense layout: batch on lanes, padded to a multiple of 128 (masked in-kernel).
    n_pad = _round_up(max(n, 1), 128)
    phi_t = jnp.pad(jnp.transpose(phi), ((0, 0), (0, n_pad - n)))      # (T+1, n_pad)
    tgt_t = jnp.pad(jnp.transpose(tgt), ((0, 0), (0, n_pad - n)))      # (4,   n_pad)

    vmem_limit, vmem_budget, min_tiles = _vmem_plan()
    phi_itemsize = phi.dtype.itemsize
    if tile_n is None:
        tile_n = _choose_tile_n(n_pad, phi_cols, phi_itemsize, vmem_budget, min_tiles)
    else:
        tile_n = max(128, _round_up(int(tile_n), 128))
        tile_n = min(tile_n, n_pad)
    g = pl.cdiv(n_pad, tile_n)

    kernel = functools.partial(
        _loss_log_haz_ind_kernel,
        num_time_bins=num_time_bins, n_rows=n, tile_n=tile_n,
    )

    cost = pl.CostEstimate(
        flops=int(8 * n * num_time_bins + 8 * n),
        transcendentals=int(2 * n * num_time_bins),
        bytes_accessed=int(n * phi_cols * phi_itemsize + 16 * n + 512 * g),
    )

    partials = pl.pallas_call(
        kernel,
        out_shape=jax.ShapeDtypeStruct((g, 1, 128), jnp.float32),
        grid_spec=pltpu.PrefetchScalarGridSpec(
            num_scalar_prefetch=0,
            grid=(g,),
            in_specs=[
                pl.BlockSpec((phi_cols, tile_n), lambda i: (0, i)),
                pl.BlockSpec((4, tile_n), lambda i: (0, i)),
            ],
            out_specs=pl.BlockSpec((1, 1, 128), lambda i: (i, 0, 0)),
        ),
        compiler_params=pltpu.CompilerParams(
            dimension_semantics=("parallel",),
            vmem_limit_bytes=vmem_limit,
        ),
        cost_estimate=cost,
    )(phi_t, tgt_t)

    surv_sum = jnp.sum(partials[:, 0, 0])
    mse_sum = jnp.sum(partials[:, 0, 1])
    hs_sum = jnp.sum(partials[:, 0, 2])

    loss_surv = surv_sum / n
    loss_mse = mse_sum / hs_sum            # same 0/0 -> NaN behaviour as the reference
    return loss_surv * alpha + loss_mse * (1.0 - alpha)


def _reference_loss(phi, tgt, alpha=0.5):
    """Pure-JAX reference mirroring the PyTorch forward exactly."""
    T = phi.shape[1] - 1
    phi_h, ind_sv = phi[:, :T], phi[:, T]
    idx = tgt[:, 0].astype(jnp.int32)
    ev, t_ind, t_org = tgt[:, 1], tgt[:, 2], tgt[:, 3]
    y = jax.nn.one_hot(idx, T, dtype=jnp.float32) * ev[:, None]
    bce = (jnp.maximum(phi_h, 0.0) - phi_h * y
           + jnp.log1p(jnp.exp(-jnp.abs(phi_h))))
    loss_surv = jnp.mean(
        jnp.take_along_axis(jnp.cumsum(bce, axis=1), idx[:, None], axis=1)[:, 0]
    )
    hs = jnp.where(t_org > 0, 1.0, 0.0)
    se = (ind_sv - t_ind) ** 2
    loss_mse = jnp.sum(se * hs) / jnp.sum(hs)
    return loss_surv * alpha + loss_mse * (1.0 - alpha)


def _make_inputs(key, n, t):
    k_phi, k_idx, k_ev, k_ind, k_org = jax.random.split(key, 5)
    phi = jax.random.normal(k_phi, (n, t + 1), dtype=jnp.float32)
    idx_durations = jax.random.randint(k_idx, (n,), 0, t).astype(jnp.float32)
    events = jax.random.bernoulli(k_ev, 0.6, (n,)).astype(jnp.float32)
    t_ind_sv = jax.random.normal(k_ind, (n,), dtype=jnp.float32)
    t_org_event = jax.random.bernoulli(k_org, 0.6, (n,)).astype(jnp.float32)
    t_org_event = t_org_event.at[0].set(1.0)   # ensure sum(hs) > 0
    tgt = jnp.stack([idx_durations, events, t_ind_sv, t_org_event], axis=1)
    return phi, tgt.astype(jnp.float32)


if __name__ == "__main__":
    key = jax.random.PRNGKey(0)
    alpha = 0.5
    k1, k2, k3 = jax.random.split(key, 3)

    # Case 1: single tile, heavy lane padding (N=16 -> 128 padded lanes), T=16.
    phi1, tgt1 = _make_inputs(k1, n=16, t=16)
    loss1 = jax.block_until_ready(loss_log_haz_ind(phi1, tgt1, alpha=alpha))
    ref1 = _reference_loss(phi1, tgt1, alpha=alpha)
    assert jnp.allclose(loss1, ref1, rtol=1e-5, atol=1e-5), (loss1, ref1)

    # Case 2: multiple grid steps + ragged tail (N=300, tile_n=256 -> n_pad=384, g=2,
    # second tile has zero-padded and OOB lanes, all masked by `valid`).
    phi2, tgt2 = _make_inputs(k2, n=300, t=16)
    loss2 = jax.block_until_ready(loss_log_haz_ind(phi2, tgt2, alpha=alpha, tile_n=256))
    ref2 = _reference_loss(phi2, tgt2, alpha=alpha)
    assert jnp.allclose(loss2, ref2, rtol=1e-5, atol=1e-5), (loss2, ref2)

    # Case 3: bf16 logits streamed directly (upcast happens inside the kernel).
    phi3, tgt3 = _make_inputs(k3, n=200, t=16)
    phi3_bf16 = phi3.astype(jnp.bfloat16)
    loss3 = jax.block_until_ready(loss_log_haz_ind(phi3_bf16, tgt3, alpha=alpha, tile_n=128))
    ref3 = _reference_loss(phi3_bf16.astype(jnp.float32), tgt3, alpha=alpha)
    assert jnp.allclose(loss3, ref3, rtol=1e-4, atol=1e-4), (loss3, ref3)

    print("KERNEL_OK")
</pallas_src>

<mosaic_0001>
module attributes {stable_mosaic.version = 11 : i64} {
  func.func @_loss_log_haz_ind_kernel(%arg0: i32, %arg1: memref<17x128xf32, #tpu.memory_space<vmem>>, %arg2: memref<4x128xf32, #tpu.memory_space<vmem>>, %arg3: memref<1x1x128xf32, #tpu.memory_space<vmem>>) attributes {dimension_semantics = [#tpu.dimension_semantics<parallel>], iteration_bounds = array<i64: 1>, scalar_prefetch = 0 : i64, scratch_operands = 0 : i64, tpu.core_type = #tpu.core_type<tc>, window_params = [{transform_indices = @transform_0, window_bounds = array<i64: 17, 128>}, {transform_indices = @transform_1, window_bounds = array<i64: 4, 128>}, {transform_indices = @transform_2, window_bounds = array<i64: 1, 1, 128>}]} {
    %c0 = arith.constant 0 : index
    %c0_0 = arith.constant 0 : index
    %0 = vector.load %arg1[%c0, %c0_0] : memref<17x128xf32, #tpu.memory_space<vmem>>, vector<17x128xf32>
    %c0_1 = arith.constant 0 : index
    %c0_2 = arith.constant 0 : index
    %1 = vector.load %arg2[%c0_1, %c0_2] : memref<4x128xf32, #tpu.memory_space<vmem>>, vector<4x128xf32>
    %2 = vector.extract_strided_slice %0 {offsets = [0, 0], sizes = [16, 128], strides = [1, 1]} : vector<17x128xf32> to vector<16x128xf32>
    %3 = vector.extract_strided_slice %0 {offsets = [16, 0], sizes = [1, 128], strides = [1, 1]} : vector<17x128xf32> to vector<1x128xf32>
    %4 = vector.extract_strided_slice %1 {offsets = [0, 0], sizes = [1, 128], strides = [1, 1]} : vector<4x128xf32> to vector<1x128xf32>
    %5 = arith.fptosi %4 : vector<1x128xf32> to vector<1x128xi32>
    %6 = vector.extract_strided_slice %1 {offsets = [1, 0], sizes = [1, 128], strides = [1, 1]} : vector<4x128xf32> to vector<1x128xf32>
    %7 = vector.extract_strided_slice %1 {offsets = [2, 0], sizes = [1, 128], strides = [1, 1]} : vector<4x128xf32> to vector<1x128xf32>
    %8 = vector.extract_strided_slice %1 {offsets = [3, 0], sizes = [1, 128], strides = [1, 1]} : vector<4x128xf32> to vector<1x128xf32>
    %9 = tpu.iota {dimensions = array<i32: 1>} : vector<1x128xi32>
    %c128_i32 = arith.constant 128 : i32
    %10 = arith.muli %arg0, %c128_i32 : i32
    %11 = vector.broadcast %10 : i32 to vector<1x128xi32>
    %12 = arith.addi %9, %11 : vector<1x128xi32>
    %c16_i32 = arith.constant 16 : i32
    %13 = vector.broadcast %c16_i32 : i32 to vector<1x128xi32>
    %14 = arith.cmpi slt, %12, %13 : vector<1x128xi32>
    %15 = tpu.iota {dimensions = array<i32: 0>} : vector<16x128xi32>
    %16 = vector.broadcast %5 : vector<1x128xi32> to vector<16x128xi32>
    %17 = arith.cmpi sle, %15, %16 : vector<16x128xi32>
    %18 = vector.broadcast %14 : vector<1x128xi1> to vector<16x128xi1>
    %19 = arith.andi %17, %18 : vector<16x128xi1>
    %20 = vector.broadcast %5 : vector<1x128xi32> to vector<16x128xi32>
    %21 = arith.cmpi eq, %15, %20 : vector<16x128xi32>
    %22 = vector.broadcast %14 : vector<1x128xi1> to vector<16x128xi1>
    %23 = arith.andi %21, %22 : vector<16x128xi1>
    %cst = arith.constant 0.000000e+00 : f32
    %24 = vector.broadcast %cst : f32 to vector<16x128xf32>
    %25 = arith.maximumf %2, %24 : vector<16x128xf32>
    %26 = math.absf %2 : vector<16x128xf32>
    %cst_3 = arith.constant 0.000000e+00 : f32
    %27 = vector.broadcast %cst_3 : f32 to vector<16x128xf32>
    %28 = arith.subf %27, %26 : vector<16x128xf32>
    %29 = math.exp %28 : vector<16x128xf32>
    %cst_4 = arith.constant 1.000000e+00 : f32
    %30 = vector.broadcast %cst_4 : f32 to vector<16x128xf32>
    %31 = arith.addf %30, %29 : vector<16x128xf32>
    %32 = math.log %31 : vector<16x128xf32>
    %33 = arith.addf %25, %32 : vector<16x128xf32>
    %cst_5 = arith.constant 0.000000e+00 : f32
    %34 = vector.broadcast %cst_5 : f32 to vector<16x128xf32>
    %35 = arith.select %19, %33, %34 : vector<16x128xi1>, vector<16x128xf32>
    %36 = vector.broadcast %6 : vector<1x128xf32> to vector<16x128xf32>
    %37 = arith.mulf %2, %36 : vector<16x128xf32>
    %cst_6 = arith.constant 0.000000e+00 : f32
    %38 = vector.broadcast %cst_6 : f32 to vector<16x128xf32>
    %39 = arith.select %23, %37, %38 : vector<16x128xi1>, vector<16x128xf32>
    %40 = arith.subf %35, %39 : vector<16x128xf32>
    %41 = vector.shape_cast %40 : vector<16x128xf32> to vector<1x16x128xf32>
    %cst_7 = arith.constant dense<0.000000e+00> : vector<1xf32>
    %42 = vector.multi_reduction <add>, %41, %cst_7 [1, 2] : vector<1x16x128xf32> to vector<1xf32>
    %43 = vector.shape_cast %42 : vector<1xf32> to vector<1x1x1xf32>
    %44 = vector.extract %43[0, 0, 0] : f32 from vector<1x1x1xf32>
    %cst_8 = arith.constant 0.000000e+00 : f32
    %45 = vector.broadcast %cst_8 : f32 to vector<1x128xf32>
    %46 = arith.cmpf ogt, %8, %45 : vector<1x128xf32>
    %47 = arith.andi %14, %46 : vector<1x128xi1>
    %48 = arith.subf %3, %7 : vector<1x128xf32>
    %49 = arith.mulf %48, %48 : vector<1x128xf32>
    %cst_9 = arith.constant 0.000000e+00 : f32
    %50 = vector.broadcast %cst_9 : f32 to vector<1x128xf32>
    %51 = arith.select %47, %49, %50 : vector<1x128xi1>, vector<1x128xf32>
    %52 = vector.shape_cast %51 : vector<1x128xf32> to vector<1x1x128xf32>
    %cst_10 = arith.constant dense<0.000000e+00> : vector<1xf32>
    %53 = vector.multi_reduction <add>, %52, %cst_10 [1, 2] : vector<1x1x128xf32> to vector<1xf32>
    %54 = vector.shape_cast %53 : vector<1xf32> to vector<1x1x1xf32>
    %55 = vector.extract %54[0, 0, 0] : f32 from vector<1x1x1xf32>
    %cst_11 = arith.constant 1.000000e+00 : f32
    %cst_12 = arith.constant 0.000000e+00 : f32
    %56 = vector.broadcast %cst_11 : f32 to vector<1x128xf32>
    %57 = vector.broadcast %cst_12 : f32 to vector<1x128xf32>
    %58 = arith.select %47, %56, %57 : vector<1x128xi1>, vector<1x128xf32>
    %59 = vector.shape_cast %58 : vector<1x128xf32> to vector<1x1x128xf32>
    %cst_13 = arith.constant dense<0.000000e+00> : vector<1xf32>
    %60 = vector.multi_reduction <add>, %59, %cst_13 [1, 2] : vector<1x1x128xf32> to vector<1xf32>
    %61 = vector.shape_cast %60 : vector<1xf32> to vector<1x1x1xf32>
    %62 = vector.extract %61[0, 0, 0] : f32 from vector<1x1x1xf32>
    %63 = tpu.iota {dimensions = array<i32: 1>} : vector<1x128xi32>
    %c0_i32 = arith.constant 0 : i32
    %64 = vector.broadcast %c0_i32 : i32 to vector<1x128xi32>
    %65 = arith.cmpi eq, %63, %64 : vector<1x128xi32>
    %cst_14 = arith.constant 0.000000e+00 : f32
    %66 = vector.broadcast %44 : f32 to vector<1x128xf32>
    %67 = vector.broadcast %cst_14 : f32 to vector<1x128xf32>
    %68 = arith.select %65, %66, %67 : vector<1x128xi1>, vector<1x128xf32>
    %c1_i32 = arith.constant 1 : i32
    %69 = vector.broadcast %c1_i32 : i32 to vector<1x128xi32>
    %70 = arith.cmpi eq, %63, %69 : vector<1x128xi32>
    %cst_15 = arith.constant 0.000000e+00 : f32
    %71 = vector.broadcast %55 : f32 to vector<1x128xf32>
    %72 = vector.broadcast %cst_15 : f32 to vector<1x128xf32>
    %73 = arith.select %70, %71, %72 : vector<1x128xi1>, vector<1x128xf32>
    %74 = arith.addf %68, %73 : vector<1x128xf32>
    %c2_i32 = arith.constant 2 : i32
    %75 = vector.broadcast %c2_i32 : i32 to vector<1x128xi32>
    %76 = arith.cmpi eq, %63, %75 : vector<1x128xi32>
    %cst_16 = arith.constant 0.000000e+00 : f32
    %77 = vector.broadcast %62 : f32 to vector<1x128xf32>
    %78 = vector.broadcast %cst_16 : f32 to vector<1x128xf32>
    %79 = arith.select %76, %77, %78 : vector<1x128xi1>, vector<1x128xf32>
    %80 = arith.addf %74, %79 : vector<1x128xf32>
    %c0_17 = arith.constant 0 : index
    %c0_18 = arith.constant 0 : index
    %c0_19 = arith.constant 0 : index
    %81 = vector.load %arg3[%c0_17, %c0_18, %c0_19] : memref<1x1x128xf32, #tpu.memory_space<vmem>>, vector<1x1x128xf32>
    %82 = vector.shape_cast %81 : vector<1x1x128xf32> to vector<1x128xf32>
    %83 = vector.shape_cast %80 : vector<1x128xf32> to vector<1x1x128xf32>
    tpu.vector_store %arg3[%c0_17, %c0_18, %c0_19], %83 {strides = array<i32>} : memref<1x1x128xf32, #tpu.memory_space<vmem>>, vector<1x1x128xf32>,
    return
  }
  func.func @transform_0(%arg0: i32) -> (i32, i32) {
    %c0_i32 = arith.constant 0 : i32
    %c0_i32_0 = arith.constant 0 : i32
    return %c0_i32, %arg0 : i32, i32
  }
  func.func @transform_1(%arg0: i32) -> (i32, i32) {
    %c0_i32 = arith.constant 0 : i32
    %c0_i32_0 = arith.constant 0 : i32
    return %c0_i32, %arg0 : i32, i32
  }
  func.func @transform_2(%arg0: i32) -> (i32, i32, i32) {
    %c0_i32 = arith.constant 0 : i32
    %c0_i32_0 = arith.constant 0 : i32
    %c0_i32_1 = arith.constant 0 : i32
    return %arg0, %c0_i32, %c0_i32_0 : i32, i32, i32
  }
}

</mosaic_0001>

<bundles_post_ra>
// kernel: tpu_custom_call.1
= control target key start
LH: loop header
LB: loop body
LE: loop exit
PB: predicated region body
PF: predicated region fallthrough
CT: control target
= control target key end

     0   :  { %7 = vsyncpa [#allocation3], 0  ;;  %s323_s0 = inlined_call_operand.hbm [shape: f32[17,128], index: 0, kind: input, shape index: {}]   ;;  %s324_s1 = inlined_call_operand.hbm [shape: f32[4,128], index: 1, kind: input, shape index: {}]   ;;  %s325_s2 = inlined_call_operand.hbm [shape: f32[1,1,128], index: 2, kind: output, shape index: {}]  }
   0x1   :  { %8 = vsyncpa [#allocation6], 0 }
   0x2   :  { %9 = vsyncpa [#allocation4], 0  ;;  %s261_s9 = smov [#allocation2]  }
   0x3   :  { %s15_s10 = sshll.u32 %s261_s9, 4  ;;  %s16_s10 = int_to_ptr.vmem [resolvable:$true] %s15_s10 }
   0x4   :  { %s203_s11 = scalar_lea.vmem %s16_s10, 384  ;;  %p208_p1 = scmp.lt.s32.totalorder %s16_s10, %s16_s10 }
   0x5   :  { %p204_p0 = scmp.ne.s32.totalorder %s16_s10, %s203_s11  ;;  %p209_p2 = scmp.lt.s32.totalorder %s203_s11, %s203_s11 }
   0x7   :  { %p210_p3 = por %p209_p2, %p208_p1 }
   0x9   :  { %p211_p4 = pnand %p210_p3, %p204_p0 }
   0xb   :  { %214 = shalt.err (!%p211_p4)
}
   0xc   :  { %s262_s12 = smov 128   ;;  %s263_s13 = smov 8  }
   0xd   :  { %21 = dma.hbm_to_vmem [thread:$0]  %s323_s0, 384, %s16_s10, [#allocation3], %s262_s12, %s262_s12, %s263_s13  }
   0xe   :  { %s264_s16 = smov [#allocation5]  }
   0xf   :  { %s28_s17 = sshll.u32 %s264_s16, 4  ;;  %s29_s17 = int_to_ptr.vmem [resolvable:$true] %s28_s17 }
  0x10   :  { %s223_s18 = scalar_lea.vmem %s29_s17, 64  ;;  %p228_p6 = scmp.lt.s32.totalorder %s29_s17, %s29_s17 }
  0x11   :  { %p224_p5 = scmp.ne.s32.totalorder %s29_s17, %s223_s18  ;;  %p229_p7 = scmp.lt.s32.totalorder %s223_s18, %s223_s18 }
  0x13   :  { %p230_p8 = por %p229_p7, %p228_p6 }
  0x15   :  { %p231_p9 = pnand %p230_p8, %p224_p5 }
  0x17   :  { %234 = shalt.err (!%p231_p9)
}
  0x18   :  { %31 = dma.hbm_to_vmem [thread:$0]  %s324_s1, 64, %s29_s17, [#allocation6]  }
  0x19   :  { %255 = dma.done.wait [#allocation3], 384  }
  0x1a   :  { %256 = vsyncadd [#allocation3], 4294966912 }
  0x1b   :  { %257 = dma.done.wait [#allocation6], 64  }
  0x1c   :  { %258 = vsyncadd [#allocation6], 4294967232  ;;  %v43_v0 = vlaneseq  ;;  %v41_v2 = vld [vmem:[#allocation5] sm:$0xf]  ;;  %v38_v3 = vld [vmem:[#allocation2] sm:$0xff]  ;;  %vm120_vm3 = vcmask 1040384  }
  0x1d   :  { %v39_v4 = vld [vmem:[#allocation2 + $0x8] sm:$0xff]  ;;  %vm106_vm1 = vcmp.gt.f32.partialorder %v41_v2, 0.0  ;;  %v68_v6 = vand.u32 2147483647, %v38_v3  ;;  %v265_v8 = vmov 0.0   ;;  %v173_v18 = vtrunc.f32 %v41_v2  ;;  %s266_s22 = smov [#allocation7]  }
  0x1e   :  { %v288_v1 = vand.u32 127, %v43_v0  ;;  %v69_v7 = vand.u32 2147483647, %v39_v4  ;;  %v50_v19 = vshrl.u32 %v43_v0, 7  ;;  %v109_v24 = vrot.slane %v41_v2, 2  ;;  %s163_s23 = sshll.u32 %s266_s22, 4  ;;  %s164_s23 = int_to_ptr.vmem [resolvable:$true] %s163_s23 }
  0x1f   :  { %v70_v11 = vsub.f32 0.0, %v68_v6  ;;  %v174_v22 = vcvt.f32.s32 %v173_v18  ;;  %v40_v25 = vld [vmem:[#allocation2 + $0x10] sm:$0x1]  ;;  %v66_v32 = vmax.f32 %v38_v3, 0.0  ;;  %v67_v36 = vmax.f32 %v39_v4, 0.0  ;;  %s235_s24 = scalar_lea.vmem %s164_s23, 16  ;;  %p240_p11 = scmp.lt.s32.totalorder %s164_s23, %s164_s23 }
  0x20   :  { %vm48_vm0 = vcmp.lt.s32.totalorder %v288_v1, 16  ;;  %v71_v12 = vsub.f32 0.0, %v69_v7  ;;  %v54_v23 = vsub.s32 0, %v50_v19  ;;  %v88_v26 = vsub.s32 1, %v50_v19  ;;  %p236_p10 = scmp.ne.s32.totalorder %s164_s23, %s235_s24  ;;  %s239_s25 = scalar_lea.vmem %s164_s23, 32 }
  0x21   :  { %vm293_vm2 = vmand %vm48_vm0, %vm106_vm1  ;;  %v72_v14 = vmul.f32 1.442695, %v70_v11  ;;  %v111_v28 = vsub.f32 %v40_v25, %v109_v24  ;;  %v51_v29 = vadd.s32 8, %v50_v19  ;;  %vm145_vm12 = vcmp.eq.s32.totalorder %v288_v1, 0  ;;  %p241_p12 = scmp.lt.s32.totalorder %s239_s25, %s235_s24 }
  0x22   :  { %v131_v9 = vsel %vm293_vm2, 1.0, %v265_v8  ;;  %v74_v15 = vmul.f32 1.442695, %v71_v12  ;;  %v55_v27 = vrot.slane %v174_v22, %v54_v23  ;;  %v89_v30 = vrot.slane %v41_v2, %v88_v26 }
  0x23   :  { %v133_v10 = vrot.slane %v131_v9, 3  ;;  %187 = vpow2.f32 %v72_v14  ;;  %v112_v31 = vmul.f32 %v111_v28, %v111_v28  ;;  %vm148_vm13 = vcmp.eq.s32.totalorder %v288_v1, 1  ;;  %p242_p13 = por %p241_p12, %p240_p11 }
  0x24   :  { %189 = vpow2.f32 %v74_v15  ;;  %vm62_vm4 = vcmp.eq.s32.totalorder %v50_v19, %v55_v27  ;;  %vm63_vm5 = vcmp.eq.s32.totalorder %v51_v29, %v55_v27  ;;  %vm56_vm6 = vcmp.le.s32.totalorder %v50_v19, %v55_v27 }
  0x25   :  { %v135_v13 = vsel %vm120_vm3, %v133_v10, 0.0  ;;  %v90_v33 = vmul.f32 %v89_v30, %v38_v3  ;;  %vm57_vm7 = vcmp.le.s32.totalorder %v51_v29, %v55_v27  ;;  %vm302_vm8 = vmand %vm62_vm4, %vm48_vm0  ;;  %v91_v37 = vmul.f32 %v89_v30, %v39_v4  ;;  %p243_p0 = pnand %p242_p13, %p236_p10 }
  0x26   :  { %136 = vadd.xlane.f32.xlu1 %v135_v13  ;;  %vm65_vm9 = vmand %vm63_vm5, %vm48_vm0  ;;  %v114_v40 = vrot.slane %v112_v31, 5  ;;  %vm152_vm14 = vcmp.eq.s32.totalorder %v288_v1, 2 }
  0x27   :  { %vm60_vm10 = vmand %vm56_vm6, %vm48_vm0  ;;  %v92_v43 = vsel %vm302_vm8, %v90_v33, 0.0  ;;  %v93_v45 = vsel %vm65_vm9, %v91_v37, 0.0 }
  0x28   :  { %vm61_vm11 = vmand %vm57_vm7, %vm48_vm0  ;;  %v116_v47 = vsel %vm293_vm2, %v114_v40, 0.0 }
  0x29   :  { %v118_v51 = vrot.slane %v116_v47, 3 }
  0x2b   :  { %v121_v53 = vsel %vm120_vm3, %v118_v51, 0.0 }
  0x30   :  { %v188_v16 = vpop.eup %187 }
  0x31   :  { %v190_v17 = vpop.eup %189  ;;  %v76_v20 = vadd.f32 1.0, %v188_v16 }
  0x32   :  { %v77_v21 = vadd.f32 1.0, %v190_v17 }
  0x33   :  { %191 = vlog2.f32 %v76_v20 }
  0x34   :  { %193 = vlog2.f32 %v77_v21 }
  0x40   :  { %v192_v34 = vpop.eup %191 }
  0x41   :  { %v194_v38 = vpop.eup %193  ;;  %v79_v39 = vmul.f32 0.6931472, %v192_v34 }
  0x42   :  { %v81_v41 = vmul.f32 0.6931472, %v194_v38 }
  0x43   :  { %v82_v42 = vadd.f32 %v79_v39, %v66_v32 }
  0x44   :  { %v83_v44 = vadd.f32 %v81_v41, %v67_v36 }
  0x45   :  { %v84_v46 = vsel %vm60_vm10, %v82_v42, 0.0 }
  0x46   :  { %v85_v48 = vsel %vm61_vm11, %v83_v44, 0.0  ;;  %v94_v49 = vsub.f32 %v84_v46, %v92_v43 }
  0x47   :  { %v95_v50 = vsub.f32 %v85_v48, %v93_v45 }
  0x49   :  { %v96_v52 = vadd.f32 %v95_v50, %v94_v49 }
  0x4b   :  { %97 = vadd.xlane.f32.xlu0 %v96_v52 }
  0x4f   :  { %122 = vadd.xlane.f32.xlu0 %v121_v53 }
  0xaf   :  { %v137_v54 = vpop.xlane.xlu1 %136 }
  0xb0   :  { %v138_v55 = vrot.slane %v137_v54, 4 }
  0xb2   :  { %v139_v56 = vadd.f32 %v138_v55, %v137_v54 }
  0xb4   :  { %v140_v60 = vrot.slane %v139_v56, 2 }
  0xb6   :  { %v141_v3 = vadd.f32 %v140_v60, %v139_v56 }
  0xb8   :  { %v142_v8 = vrot.slane %v141_v3, 1 }
  0xba   :  { %v143_v11 = vadd.f32 %v142_v8, %v141_v3 }
  0xd4   :  { %v98_v57 = vpop.xlane.xlu0 %97 }
  0xd5   :  { %v99_v58 = vrot.slane %v98_v57, 4 }
  0xd7   :  { %v100_v59 = vadd.f32 %v99_v58, %v98_v57 }
  0xd8   :  { %v123_v61 = vpop.xlane.xlu0 %122 }
  0xd9   :  { %v101_v62 = vrot.slane %v100_v59, 2  ;;  %v124_v63 = vrot.slane %v123_v61, 4 }
  0xdb   :  { %v125_v0 = vadd.f32 %v124_v63, %v123_v61  ;;  %v102_v2 = vadd.f32 %v101_v62, %v100_v59 }
  0xdd   :  { %v126_v4 = vrot.slane %v125_v0, 2  ;;  %v103_v5 = vrot.slane %v102_v2, 1 }
  0xdf   :  { %v127_v6 = vadd.f32 %v126_v4, %v125_v0  ;;  %v104_v7 = vadd.f32 %v103_v5, %v102_v2 }
  0xe1   :  { %175 = vpush %v104_v7  ;;  %v128_v9 = vrot.slane %v127_v6, 1 }
  0xe3   :  { %v129_v10 = vadd.f32 %v128_v9, %v127_v6 }
  0xe5   :  { %177 = vpush %v129_v10 }
  0xe6   :  { %179 = vpush %v143_v11 }
 0x112   :  { %s176_s0 = spop %175 }
 0x113   :  { %v146_v12 = vstv %s176_s0 }
 0x114   :  { %v147_v14 = vsel %vm145_vm12, %v146_v12, 0.0 }
 0x116   :  { %s178_s1 = spop %177 }
 0x117   :  { %v149_v13 = vstv %s178_s1  ;;  %s180_s21 = spop %179 }
 0x118   :  { %v150_v15 = vsel %vm148_vm13, %v149_v13, 0.0  ;;  %v153_v16 = vstv %s180_s21 }
 0x119   :  { %v151_v17 = vadd.f32 %v150_v15, %v147_v14  ;;  %v154_v18 = vsel %vm152_vm14, %v153_v16, 0.0 }
 0x11b   :  { %v155_v19 = vadd.f32 %v154_v18, %v151_v17 }
 0x11d   :  { %156 = vst [vmem:[#allocation7] sm:$0x1] %v155_v19 }
 0x11e   :  { %246 = shalt.err (!%p243_p0)
}
 0x11f   :  { %166 = dma.vmem_to_hbm [thread:$0]  %s164_s23, 16, %s325_s2, [#allocation4]  }
 0x120   :  { %259 = dma.done.wait [#allocation4], 16  }
 0x121   :  { %260 = vsyncadd [#allocation4], 4294967280 }
 0x122   :  { %170 = vsyncpa [#allocation3], 1 }
 0x123   :  { %171 = vsyncpa [#allocation6], 1 }
 0x124   :  { %172 = vsyncpa [#allocation4], 1 }

</bundles_post_ra>
